<compile_context>
chip_gen: v5e
topology: v5e:2x2
jax: 0.10.0
libtpu: 0.0.40
codegen_flags: <defaults>
</compile_context>

<pallas_src>
import functools
import numpy as np
import jax
import jax.numpy as jnp
from jax.experimental import pallas as pl
from jax.experimental.pallas import tpu as pltpu


def _round_up(n, m):
    return (n + m - 1) // m * m


def _pad_cols(a, cols):
    if a.shape[-1] == cols:
        return a
    pad = [(0, 0)] * (a.ndim - 1) + [(0, cols - a.shape[-1])]
    return jnp.pad(a, pad)


# ----------------------------------------------------------------------------
# Fused kernel.  Per D-tile (T = tile_d lanes):
#   den = mpool @ Wc                         (MXU, bf16 in / f32 acc)
#       + sum_j A_x[:,j]   * x[j]            (f32 VPU axpys, b terms)
#       + (sum_j A_img[:,j]* img[j]) * wi
#   den = masked_init + nmask * den          (mask variant only)
# ----------------------------------------------------------------------------
def _fused_body(x_ref, img_ref, wc_ref, wi_ref, ax_ref, aimg_ref, mpool_ref):
    b = x_ref.shape[0]
    x = x_ref[...].astype(jnp.float32)        # [b, T]
    img = img_ref[...].astype(jnp.float32)    # [b, T]
    wi = wi_ref[...].astype(jnp.float32)      # [1, T]
    ax = ax_ref[...]                          # [B, b] f32 (resident)
    aimg = aimg_ref[...]                      # [B, b] f32 (resident)

    # pooled cross-attn bias on the idle MXU
    den = jnp.dot(mpool_ref[...], wc_ref[...],
                  preferred_element_type=jnp.float32)          # [B, T]

    # folded CFG combine: tiny, exact f32 axpys (b is small, static unroll)
    xacc = ax[:, 0:1] * x[0:1, :]
    iacc = aimg[:, 0:1] * img[0:1, :]
    for j in range(1, b):
        xacc = xacc + ax[:, j:j + 1] * x[j:j + 1, :]
        iacc = iacc + aimg[:, j:j + 1] * img[j:j + 1, :]
    return den + xacc + iacc * wi                               # [B, T] f32


def fused_cfg_kernel_nomask(x_ref, img_ref, wc_ref, wi_ref,
                            ax_ref, aimg_ref, mpool_ref, out_ref):
    den = _fused_body(x_ref, img_ref, wc_ref, wi_ref, ax_ref, aimg_ref, mpool_ref)
    out_ref[...] = den.astype(out_ref.dtype)


def fused_cfg_kernel_mask(x_ref, img_ref, wc_ref, wi_ref,
                          ax_ref, aimg_ref, mpool_ref,
                          mi_ref, nm_ref, out_ref):
    den = _fused_body(x_ref, img_ref, wc_ref, wi_ref, ax_ref, aimg_ref, mpool_ref)
    den = mi_ref[...].astype(jnp.float32) + nm_ref[...].astype(jnp.float32) * den
    out_ref[...] = den.astype(out_ref.dtype)


def _run_fused(x2, img2, wc_p, wi_p, a_x, a_img, mpool,
               mi=None, nm=None, *, tile_d):
    b, dp = x2.shape
    hd = wc_p.shape[0]
    bb = a_x.shape[0]
    n_tiles = dp // tile_d

    col = lambda i: (0, i)    # tiled along D
    res = lambda i: (0, 0)    # resident (fetched once)

    in_specs = [
        pl.BlockSpec((b, tile_d), col),    # x            bf16
        pl.BlockSpec((b, tile_d), col),    # image cond   bf16
        pl.BlockSpec((hd, tile_d), col),   # Wc           bf16 (dominant stream)
        pl.BlockSpec((1, tile_d), col),    # wi           bf16
        pl.BlockSpec((bb, b), res),        # A_x          f32
        pl.BlockSpec((bb, b), res),        # A_img        f32
        pl.BlockSpec((bb, hd), res),       # mpool        bf16
    ]
    args = [x2, img2, wc_p, wi_p, a_x, a_img, mpool]

    if mi is not None:
        kernel = fused_cfg_kernel_mask
        in_specs += [pl.BlockSpec((bb, tile_d), col),   # init_latent*mask  bf16
                     pl.BlockSpec((bb, tile_d), col)]   # nmask             bf16
        args += [mi, nm]
    else:
        kernel = fused_cfg_kernel_nomask

    # explicit VMEM budget: double-buffered streamed blocks + margin
    bf16_rows = 2 * b + hd + 1 + (2 * bb if mi is not None else 0)
    need = 2 * tile_d * (bf16_rows * 2 + bb * 4)
    vmem_limit = int(min(64 << 20, max(32 << 20, need + (8 << 20))))

    return pl.pallas_call(
        kernel,
        out_shape=jax.ShapeDtypeStruct((bb, dp), jnp.float32),
        grid=(n_tiles,),
        in_specs=in_specs,
        out_specs=pl.BlockSpec((bb, tile_d), col),
        compiler_params=pltpu.CompilerParams(
            dimension_semantics=("parallel",),      # shard D-tiles across TCs (v7x)
            vmem_limit_bytes=vmem_limit),
    )(*args)


# ----------------------------------------------------------------------------
# Device-side forward (jitted): pad/cast, fold the combine, run the kernel.
# ----------------------------------------------------------------------------
def _prep(x, sigma, tensor, uncond, image_cond, m_mat, rep_idx, wc_p):
    b = x.shape[0]
    dp = wc_p.shape[1]

    x2 = _pad_cols(x.reshape(b, -1).astype(jnp.bfloat16), dp)
    img2 = _pad_cols(image_cond.reshape(b, -1).astype(jnp.bfloat16), dp)

    full_idx = jnp.concatenate([rep_idx, jnp.arange(b, dtype=jnp.int32)])  # [N]
    sigma_in = sigma[full_idx].astype(jnp.float32)
    scale = 1.0 / (sigma_in * sigma_in + 1.0)                              # [N]
    gmat = jax.nn.one_hot(full_idx, b, dtype=jnp.float32)                  # [N, b]

    a_x = jnp.dot(m_mat, scale[:, None] * gmat)                            # [B, b]
    a_img = jnp.dot(m_mat, gmat)                                           # [B, b]

    cond_in = jnp.concatenate([tensor, uncond], axis=0)                    # [N, S, Hd]
    cpool = jnp.mean(cond_in.astype(jnp.float32), axis=1)
    cpool = cpool.astype(jnp.bfloat16).astype(jnp.float32)                 # stream precision
    mpool = jnp.dot(m_mat, cpool).astype(jnp.bfloat16)                     # [B, Hd]
    return x2, img2, a_x, a_img, mpool


@functools.partial(jax.jit, static_argnames=("tile_d",))
def _device_forward_nomask(x, sigma, tensor, uncond, image_cond,
                           m_mat, rep_idx, wc_p, wi_p, *, tile_d):
    b, c, h, w = x.shape
    d = c * h * w
    x2, img2, a_x, a_img, mpool = _prep(x, sigma, tensor, uncond, image_cond,
                                        m_mat, rep_idx, wc_p)
    den = _run_fused(x2, img2, wc_p, wi_p, a_x, a_img, mpool, tile_d=tile_d)
    return den[:, :d].reshape(b, c, h, w)


@functools.partial(jax.jit, static_argnames=("tile_d",))
def _device_forward_mask(x, sigma, tensor, uncond, image_cond,
                         m_mat, rep_idx, wc_p, wi_p, mi, nm, *, tile_d):
    b, c, h, w = x.shape
    d = c * h * w
    x2, img2, a_x, a_img, mpool = _prep(x, sigma, tensor, uncond, image_cond,
                                        m_mat, rep_idx, wc_p)
    den = _run_fused(x2, img2, wc_p, wi_p, a_x, a_img, mpool, mi, nm,
                     tile_d=tile_d)
    return den[:, :d].reshape(b, c, h, w)


# ----------------------------------------------------------------------------
# CFGDenoiser wrapper (mirrors the PyTorch forward control flow)
# ----------------------------------------------------------------------------
class CFGDenoiserPallas:
    def __init__(self, wc, wi, tile_d=1024):
        hd, d = wc.shape
        self.D = d
        td = max(128, (min(int(tile_d), 4096) // 128) * 128)
        td = min(td, _round_up(d, 128))
        # keep double-buffered streamed blocks <= ~40 MiB (fits v7x's 64 MiB VMEM)
        budget = 40 << 20
        per_col = 2 * ((hd + 4 * 8 + 1) * 2 + 8 * 4)   # conservative b<=8 estimate
        while td > 128 and per_col * td > budget:
            td -= 128
        self.tile_d = td
        self.Dp = _round_up(d, td)
        # hoist weight padding + bf16 cast out of the per-step path
        self.wc = _pad_cols(jnp.asarray(wc, jnp.bfloat16), self.Dp)
        self.wi = _pad_cols(jnp.asarray(wi, jnp.bfloat16).reshape(1, d), self.Dp)
        self.mask = None
        self.nmask = None
        self.init_latent = None
        self.step = 0
        self._combine_cache = None
        self._mask_cache = None

    def _combine_matrix(self, conds_list, cond_scale, nc, b):
        key = (tuple(tuple((int(ci), float(w)) for ci, w in conds)
                     for conds in conds_list), float(cond_scale), nc, b)
        if self._combine_cache is not None and self._combine_cache[0] == key:
            return self._combine_cache[1]
        m = np.zeros((b, nc + b), np.float32)
        for i, conds in enumerate(conds_list):
            m[i, nc + i] = 1.0
            for ci, w in conds:
                m[i, ci] += w * cond_scale
                m[i, nc + i] -= w * cond_scale
        m = jnp.asarray(m)
        self._combine_cache = (key, m)
        return m

    def _mask_tensors(self, shape):
        # init_latent/mask/nmask are constant across sampler steps -> cache the
        # broadcast + masked-init multiply + bf16 cast + pad.
        key = (id(self.init_latent), id(self.mask), id(self.nmask), shape)
        if self._mask_cache is not None and self._mask_cache[0] == key:
            return self._mask_cache[1]
        b = shape[0]
        init_b = jnp.broadcast_to(self.init_latent, shape).astype(jnp.float32)
        mask_b = jnp.broadcast_to(self.mask, shape).astype(jnp.float32)
        nmask_b = jnp.broadcast_to(self.nmask, shape).astype(jnp.float32)
        mi = _pad_cols((init_b * mask_b).reshape(b, -1).astype(jnp.bfloat16), self.Dp)
        nm = _pad_cols(nmask_b.reshape(b, -1).astype(jnp.bfloat16), self.Dp)
        self._mask_cache = (key, (mi, nm))
        return mi, nm

    def forward(self, x, sigma, uncond, tensor, conds_list, cond_scale, image_cond):
        # TODO(synk): state.interrupted/skipped, cfg_denoiser_callback /
        # CFGDenoiserParams, prompt_parser.reconstruct_* (conds_list / tensor /
        # uncond arrive already reconstructed), devices.test_for_nans,
        # store_latent / live preview, shared.batch_cond_uncond chunked
        # inner-model calls — host-side framework plumbing, no Pallas equivalent.
        b, c, h, w = x.shape
        d = c * h * w
        assert d == self.D
        batch_size = len(conds_list)
        repeats = [len(conds_list[i]) for i in range(batch_size)]
        rep_idx = jnp.asarray(
            [i for i, n in enumerate(repeats) for _ in range(n)], jnp.int32)
        nc = int(sum(repeats))
        assert tensor.shape[1] == uncond.shape[1]

        m_mat = self._combine_matrix(conds_list, cond_scale, nc, b)

        if self.mask is not None:
            mi, nm = self._mask_tensors(x.shape)
            den = _device_forward_mask(x, sigma, tensor, uncond, image_cond,
                                       m_mat, rep_idx, self.wc, self.wi,
                                       mi, nm, tile_d=self.tile_d)
        else:
            den = _device_forward_nomask(x, sigma, tensor, uncond, image_cond,
                                         m_mat, rep_idx, self.wc, self.wi,
                                         tile_d=self.tile_d)
        self.step += 1
        return den


# ----------------------------------------------------------------------------
# pure-JAX reference (mirrors the PyTorch loops); big tensors are passed
# through bf16 once to match the kernel's streaming precision, math in f32.
# ----------------------------------------------------------------------------
def reference_forward(x, sigma, uncond, tensor, conds_list, cond_scale, image_cond,
                      wc, wi, init_latent=None, mask=None, nmask=None):
    bf = lambda a: a.astype(jnp.bfloat16).astype(jnp.float32)
    b = x.shape[0]
    repeats = [len(cl) for cl in conds_list]
    rep_idx = jnp.asarray([i for i, n in enumerate(repeats) for _ in range(n)],
                          jnp.int32)
    x_in = jnp.concatenate([x[rep_idx], x], axis=0)
    image_cond_in = jnp.concatenate([image_cond[rep_idx], image_cond], axis=0)
    sigma_in = jnp.concatenate([sigma[rep_idx], sigma], axis=0)
    cond_in = jnp.concatenate([tensor, uncond], axis=0)

    n_rows = x_in.shape[0]
    c, h, w = x.shape[1:]
    d = c * h * w
    scale = (1.0 / (sigma_in * sigma_in + 1.0))[:, None]
    cpool = bf(jnp.mean(cond_in, axis=1))
    x_out = (bf(x_in.reshape(n_rows, d)) * scale
             + jnp.dot(cpool, bf(wc), precision=jax.lax.Precision.HIGHEST)
             + bf(image_cond_in.reshape(n_rows, d)) * bf(wi)
             ).reshape(n_rows, c, h, w)

    du = x_out[-b:]
    den = du
    for i, conds in enumerate(conds_list):
        for ci, wgt in conds:
            den = den.at[i].add((x_out[ci] - du[i]) * (wgt * cond_scale))
    if mask is not None:
        den = bf(init_latent) * bf(mask) + bf(nmask) * den
    return den


if __name__ == "__main__":
    key = jax.random.PRNGKey(0)
    ks = jax.random.split(key, 8)

    B, C, H, W = 2, 4, 16, 16          # latent batch (NCHW)
    S, Hd = 8, 32                      # prompt seq length, hidden size
    D = C * H * W

    x = jax.random.normal(ks[0], (B, C, H, W), jnp.float32)
    sigma = jnp.asarray([1.5, 0.7], jnp.float32)
    image_cond = jax.random.normal(ks[1], (B, C, H, W), jnp.float32)

    # "reconstructed" multicond batch: sample 0 has 2 sub-prompts, sample 1 has 1
    conds_list = [[(0, 1.0), (1, 0.6)], [(2, 1.0)]]
    tensor = jax.random.normal(ks[2], (3, S, Hd), jnp.float32)   # cond embeddings
    uncond = jax.random.normal(ks[3], (B, S, Hd), jnp.float32)   # negative prompt
    cond_scale = 7.0

    # deterministic synthetic inner-model parameters
    wc = jax.random.normal(ks[4], (Hd, D), jnp.float32) * 0.05
    wi = jax.random.normal(ks[5], (1, D), jnp.float32) * 0.05

    # --- txt2img path (no inpainting mask), default tile_d=1024 -------------
    model = CFGDenoiserPallas(wc, wi)
    den0 = jax.block_until_ready(
        model.forward(x, sigma, uncond, tensor, conds_list, cond_scale, image_cond))
    ref0 = reference_forward(x, sigma, uncond, tensor, conds_list, cond_scale,
                             image_cond, wc, wi)
    assert den0.shape == (B, C, H, W)
    assert jnp.allclose(den0, ref0, atol=1e-2, rtol=1e-2), "no-mask path mismatch"

    # --- multi-tile grid coverage (D=1024, tile_d=256 -> 4 D-tiles) ---------
    model_mt = CFGDenoiserPallas(wc, wi, tile_d=256)
    den_mt = jax.block_until_ready(
        model_mt.forward(x, sigma, uncond, tensor, conds_list, cond_scale, image_cond))
    assert jnp.allclose(den_mt, ref0, atol=1e-2, rtol=1e-2), "multi-tile mismatch"

    # --- inpainting path (mask blend) ----------------------------------------
    model.init_latent = jax.random.normal(ks[6], (B, C, H, W), jnp.float32)
    m = (jax.random.uniform(ks[7], (B, 1, H, W)) > 0.5).astype(jnp.float32)
    model.mask = jnp.broadcast_to(m, (B, C, H, W))
    model.nmask = 1.0 - model.mask

    den1 = jax.block_until_ready(
        model.forward(x, sigma, uncond, tensor, conds_list, cond_scale, image_cond))
    ref1 = reference_forward(x, sigma, uncond, tensor, conds_list, cond_scale,
                             image_cond, wc, wi,
                             model.init_latent, model.mask, model.nmask)
    assert den1.shape == (B, C, H, W)
    assert jnp.allclose(den1, ref1, atol=1e-2, rtol=1e-2), "mask path mismatch"

    print("KERNEL_OK")
</pallas_src>

<mosaic_0001>
module attributes {stable_mosaic.version = 11 : i64} {
  func.func @fused_cfg_kernel_nomask(%arg0: i32, %arg1: memref<2x1024xbf16, #tpu.memory_space<vmem>>, %arg2: memref<2x1024xbf16, #tpu.memory_space<vmem>>, %arg3: memref<32x1024xbf16, #tpu.memory_space<vmem>>, %arg4: memref<1x1024xbf16, #tpu.memory_space<vmem>>, %arg5: memref<2x2xf32, #tpu.memory_space<vmem>>, %arg6: memref<2x2xf32, #tpu.memory_space<vmem>>, %arg7: memref<2x32xbf16, #tpu.memory_space<vmem>>, %arg8: memref<2x1024xf32, #tpu.memory_space<vmem>>) attributes {dimension_semantics = [#tpu.dimension_semantics<parallel>], iteration_bounds = array<i64: 1>, scalar_prefetch = 0 : i64, scratch_operands = 0 : i64, tpu.core_type = #tpu.core_type<tc>, window_params = [{transform_indices = @transform_0, window_bounds = array<i64: 2, 1024>}, {transform_indices = @transform_1, window_bounds = array<i64: 2, 1024>}, {transform_indices = @transform_2, window_bounds = array<i64: 32, 1024>}, {transform_indices = @transform_3, window_bounds = array<i64: 1, 1024>}, {pipeline_mode = #tpu.pipeline_mode<synchronous>, transform_indices = @transform_4, window_bounds = array<i64: 2, 2>}, {pipeline_mode = #tpu.pipeline_mode<synchronous>, transform_indices = @transform_5, window_bounds = array<i64: 2, 2>}, {pipeline_mode = #tpu.pipeline_mode<synchronous>, transform_indices = @transform_6, window_bounds = array<i64: 2, 32>}, {transform_indices = @transform_7, window_bounds = array<i64: 2, 1024>}]} {
    %c0 = arith.constant 0 : index
    %c0_0 = arith.constant 0 : index
    %0 = vector.load %arg1[%c0, %c0_0] : memref<2x1024xbf16, #tpu.memory_space<vmem>>, vector<2x1024xbf16>
    %1 = arith.extf %0 : vector<2x1024xbf16> to vector<2x1024xf32>
    %c0_1 = arith.constant 0 : index
    %c0_2 = arith.constant 0 : index
    %2 = vector.load %arg2[%c0_1, %c0_2] : memref<2x1024xbf16, #tpu.memory_space<vmem>>, vector<2x1024xbf16>
    %3 = arith.extf %2 : vector<2x1024xbf16> to vector<2x1024xf32>
    %c0_3 = arith.constant 0 : index
    %c0_4 = arith.constant 0 : index
    %4 = vector.load %arg4[%c0_3, %c0_4] : memref<1x1024xbf16, #tpu.memory_space<vmem>>, vector<1x1024xbf16>
    %5 = arith.extf %4 : vector<1x1024xbf16> to vector<1x1024xf32>
    %c0_5 = arith.constant 0 : index
    %c0_6 = arith.constant 0 : index
    %6 = vector.load %arg5[%c0_5, %c0_6] : memref<2x2xf32, #tpu.memory_space<vmem>>, vector<2x2xf32>
    %c0_7 = arith.constant 0 : index
    %c0_8 = arith.constant 0 : index
    %7 = vector.load %arg6[%c0_7, %c0_8] : memref<2x2xf32, #tpu.memory_space<vmem>>, vector<2x2xf32>
    %c0_9 = arith.constant 0 : index
    %c0_10 = arith.constant 0 : index
    %8 = vector.load %arg7[%c0_9, %c0_10] : memref<2x32xbf16, #tpu.memory_space<vmem>>, vector<2x32xbf16>
    %c0_11 = arith.constant 0 : index
    %c0_12 = arith.constant 0 : index
    %9 = vector.load %arg3[%c0_11, %c0_12] : memref<32x1024xbf16, #tpu.memory_space<vmem>>, vector<32x1024xbf16>
    %cst = arith.constant dense<0.000000e+00> : vector<2x1024xf32>
    %10 = tpu.matmul %8, %9, %cst {dimension_numbers = #tpu.dot_dimension_numbers<[1], [0], [0], [1], [0, 0, 1, 1], [], []>} : vector<2x32xbf16>, vector<32x1024xbf16>, vector<2x1024xf32> -> vector<2x1024xf32>
    %11 = vector.extract_strided_slice %6 {offsets = [0, 0], sizes = [2, 1], strides = [1, 1]} : vector<2x2xf32> to vector<2x1xf32>
    %12 = vector.extract_strided_slice %1 {offsets = [0, 0], sizes = [1, 1024], strides = [1, 1]} : vector<2x1024xf32> to vector<1x1024xf32>
    %13 = vector.broadcast %11 : vector<2x1xf32> to vector<2x1024xf32>
    %14 = vector.broadcast %12 : vector<1x1024xf32> to vector<2x1024xf32>
    %15 = arith.mulf %13, %14 : vector<2x1024xf32>
    %16 = vector.extract_strided_slice %7 {offsets = [0, 0], sizes = [2, 1], strides = [1, 1]} : vector<2x2xf32> to vector<2x1xf32>
    %17 = vector.extract_strided_slice %3 {offsets = [0, 0], sizes = [1, 1024], strides = [1, 1]} : vector<2x1024xf32> to vector<1x1024xf32>
    %18 = vector.broadcast %16 : vector<2x1xf32> to vector<2x1024xf32>
    %19 = vector.broadcast %17 : vector<1x1024xf32> to vector<2x1024xf32>
    %20 = arith.mulf %18, %19 : vector<2x1024xf32>
    %21 = vector.extract_strided_slice %6 {offsets = [0, 1], sizes = [2, 1], strides = [1, 1]} : vector<2x2xf32> to vector<2x1xf32>
    %22 = vector.extract_strided_slice %1 {offsets = [1, 0], sizes = [1, 1024], strides = [1, 1]} : vector<2x1024xf32> to vector<1x1024xf32>
    %23 = vector.broadcast %21 : vector<2x1xf32> to vector<2x1024xf32>
    %24 = vector.broadcast %22 : vector<1x1024xf32> to vector<2x1024xf32>
    %25 = arith.mulf %23, %24 : vector<2x1024xf32>
    %26 = arith.addf %15, %25 : vector<2x1024xf32>
    %27 = vector.extract_strided_slice %7 {offsets = [0, 1], sizes = [2, 1], strides = [1, 1]} : vector<2x2xf32> to vector<2x1xf32>
    %28 = vector.extract_strided_slice %3 {offsets = [1, 0], sizes = [1, 1024], strides = [1, 1]} : vector<2x1024xf32> to vector<1x1024xf32>
    %29 = vector.broadcast %27 : vector<2x1xf32> to vector<2x1024xf32>
    %30 = vector.broadcast %28 : vector<1x1024xf32> to vector<2x1024xf32>
    %31 = arith.mulf %29, %30 : vector<2x1024xf32>
    %32 = arith.addf %20, %31 : vector<2x1024xf32>
    %33 = arith.addf %10, %26 : vector<2x1024xf32>
    %34 = vector.broadcast %5 : vector<1x1024xf32> to vector<2x1024xf32>
    %35 = arith.mulf %32, %34 : vector<2x1024xf32>
    %36 = arith.addf %33, %35 : vector<2x1024xf32>
    %c0_13 = arith.constant 0 : index
    %c0_14 = arith.constant 0 : index
    %37 = vector.load %arg8[%c0_13, %c0_14] : memref<2x1024xf32, #tpu.memory_space<vmem>>, vector<2x1024xf32>
    tpu.vector_store %arg8[%c0_13, %c0_14], %36 {strides = array<i32>} : memref<2x1024xf32, #tpu.memory_space<vmem>>, vector<2x1024xf32>,
    return
  }
  func.func @transform_0(%arg0: i32) -> (i32, i32) {
    %c0_i32 = arith.constant 0 : i32
    %c0_i32_0 = arith.constant 0 : i32
    return %c0_i32, %arg0 : i32, i32
  }
  func.func @transform_1(%arg0: i32) -> (i32, i32) {
    %c0_i32 = arith.constant 0 : i32
    %c0_i32_0 = arith.constant 0 : i32
    return %c0_i32, %arg0 : i32, i32
  }
  func.func @transform_2(%arg0: i32) -> (i32, i32) {
    %c0_i32 = arith.constant 0 : i32
    %c0_i32_0 = arith.constant 0 : i32
    return %c0_i32, %arg0 : i32, i32
  }
  func.func @transform_3(%arg0: i32) -> (i32, i32) {
    %c0_i32 = arith.constant 0 : i32
    %c0_i32_0 = arith.constant 0 : i32
    return %c0_i32, %arg0 : i32, i32
  }
  func.func @transform_4(%arg0: i32) -> (i32, i32) {
    %c0_i32 = arith.constant 0 : i32
    %c0_i32_0 = arith.constant 0 : i32
    %c0_i32_1 = arith.constant 0 : i32
    return %c0_i32, %c0_i32_0 : i32, i32
  }
  func.func @transform_5(%arg0: i32) -> (i32, i32) {
    %c0_i32 = arith.constant 0 : i32
    %c0_i32_0 = arith.constant 0 : i32
    %c0_i32_1 = arith.constant 0 : i32
    return %c0_i32, %c0_i32_0 : i32, i32
  }
  func.func @transform_6(%arg0: i32) -> (i32, i32) {
    %c0_i32 = arith.constant 0 : i32
    %c0_i32_0 = arith.constant 0 : i32
    %c0_i32_1 = arith.constant 0 : i32
    return %c0_i32, %c0_i32_0 : i32, i32
  }
  func.func @transform_7(%arg0: i32) -> (i32, i32) {
    %c0_i32 = arith.constant 0 : i32
    %c0_i32_0 = arith.constant 0 : i32
    return %c0_i32, %arg0 : i32, i32
  }
}

</mosaic_0001>

<bundles_post_ra>
// kernel: _device_forward_nomask.1
= control target key start
LH: loop header
LB: loop body
LE: loop exit
PB: predicated region body
PF: predicated region fallthrough
CT: control target
= control target key end

     0   :  { %vm301_vm0 = vcmask 261120   ;;  %v575_v3 = vmov 1   ;;  %v576_v4 = vmov 0   ;;  %vm465_vm1 = vcmask 1041408   ;;  %s833_s2 = inlined_call_operand.vmem [shape: bf16[32,1024], index: 2, kind: input, shape index: {}]   ;;  %s834_s6 = inlined_call_operand.vmem [shape: bf16[2,32], index: 6, kind: input, shape index: {}]   ;;  %s835_s4 = inlined_call_operand.vmem [shape: f32[2,2], index: 4, kind: input, shape index: {}]   ;;  %s836_s5 = inlined_call_operand.vmem [shape: f32[2,2], index: 5, kind: input, shape index: {}]   ;;  %s837_s0 = inlined_call_operand.vmem [shape: bf16[2,1024], index: 0, kind: input, shape index: {}]   ;;  %s838_s1 = inlined_call_operand.vmem [shape: bf16[2,1024], index: 1, kind: input, shape index: {}]   ;;  %s839_s3 = inlined_call_operand.vmem [shape: bf16[1,1024], index: 3, kind: input, shape index: {}]   ;;  %s840_s7 = inlined_call_operand.vmem [shape: f32[2,1024], index: 7, kind: output, shape index: {}]  }
   0x1   :  { %v516_v0 = vld [vmem:[%s833_s2 + $0x40] sm:$0xf]  ;;  %v562_v2 = vld [vmem:[%s833_s2 + $0x44] sm:$0xf]  ;;  %573 = vset.pattern.permute.xlu1 %v575_v3  ;;  %572 = vset.pattern.permute.xlu0 %v576_v4  ;;  %v524_v7 = vld [vmem:[%s833_s2 + $0x48] sm:$0xf] }
   0x2   :  { %v566_v1 = vld [vmem:[%s833_s2 + $0x5c] sm:$0xf0]  ;;  %v518_v6 = vld [vmem:[%s833_s2 + $0x60] sm:$0xf0]  ;;  %v567_v8 = vld [vmem:[%s833_s2 + $0x64] sm:$0xf0] }
   0x3   :  { %v517_v5 = vor.u32 %v566_v1, %v516_v0  ;;  %v521_v9 = vor.u32 %v562_v2, %v518_v6  ;;  %v525_v10 = vor.u32 %v567_v8, %v524_v7  ;;  %v563_v11 = vld [vmem:[%s833_s2 + $0x4c] sm:$0xf]  ;;  %v484_v13 = vld [vmem:[%s833_s2] sm:$0xf]  ;;  %v554_v16 = vld [vmem:[%s833_s2 + $0x4] sm:$0xf] }
   0x4   :  { %v526_v12 = vld [vmem:[%s833_s2 + $0x68] sm:$0xf0]  ;;  %v558_v15 = vld [vmem:[%s833_s2 + $0x1c] sm:$0xf0]  ;;  %v486_v17 = vld [vmem:[%s833_s2 + $0x20] sm:$0xf0] }
   0x5   :  { %311 = vmatpush.bf16.msra.mxu0 %v517_v5  ;;  %v529_v14 = vor.u32 %v563_v11, %v526_v12  ;;  %324 = vmatpush.bf16.msra.mxu1 %v521_v9  ;;  %v485_v18 = vor.u32 %v558_v15, %v484_v13  ;;  %v489_v19 = vor.u32 %v554_v16, %v486_v17  ;;  %v492_v20 = vld [vmem:[%s833_s2 + $0x8] sm:$0xf]  ;;  %v555_v22 = vld [vmem:[%s833_s2 + $0xc] sm:$0xf]  ;;  %v38_v25 = vld [vmem:[%s834_s6] sm:$0x1] }
   0x6   :  { %337 = vmatpush.bf16.msra.mxu2 %v525_v10  ;;  %v559_v21 = vld [vmem:[%s833_s2 + $0x24] sm:$0xf0]  ;;  %v494_v24 = vld [vmem:[%s833_s2 + $0x28] sm:$0xf0]  ;;  %v540_v26 = vld [vmem:[%s833_s2 + $0x58] sm:$0xf] }
   0x7   :  { %350 = vmatpush.bf16.msra.mxu3 %v529_v14  ;;  %v493_v23 = vor.u32 %v559_v21, %v492_v20  ;;  %v497_v27 = vor.u32 %v555_v22, %v494_v24  ;;  %v569_v28 = vld [vmem:[%s833_s2 + $0x74] sm:$0xf0]  ;;  %v565_v29 = vld [vmem:[%s833_s2 + $0x5c] sm:$0xf]  ;;  %v36_v33 = vld [vmem:[%s835_s4] sm:$0x3] }
   0x8   :  { %v542_v30 = vld [vmem:[%s833_s2 + $0x78] sm:$0xf0]  ;;  %v541_v31 = vor.u32 %v569_v28, %v540_v26  ;;  %v564_v34 = vld [vmem:[%s833_s2 + $0x54] sm:$0xf]  ;;  %v532_v36 = vld [vmem:[%s833_s2 + $0x50] sm:$0xf]  ;;  %134 = vperm.xlu1 %573, %v36_v33   ;;  %57 = vperm.xlu0 %572, %v36_v33  }
   0x9   :  { %312 = vmatpush.bf16.msra.mxu0 %v485_v18  ;;  %v545_v32 = vor.u32 %v565_v29, %v542_v30  ;;  %v534_v35 = vld [vmem:[%s833_s2 + $0x70] sm:$0xf0]  ;;  %325 = vmatpush.bf16.msra.mxu1 %v489_v19  ;;  %v568_v37 = vld [vmem:[%s833_s2 + $0x6c] sm:$0xf0]  ;;  %v508_v38 = vld [vmem:[%s833_s2 + $0x18] sm:$0xf] }
   0xa   :  { %338 = vmatpush.bf16.msra.mxu2 %v493_v23  ;;  %v537_v39 = vor.u32 %v564_v34, %v534_v35  ;;  %v561_v40 = vld [vmem:[%s833_s2 + $0x34] sm:$0xf0]  ;;  %v557_v41 = vld [vmem:[%s833_s2 + $0x1c] sm:$0xf]  ;;  %v533_v43 = vor.u32 %v568_v37, %v532_v36  ;;  %v500_v45 = vld [vmem:[%s833_s2 + $0x10] sm:$0xf] }
   0xb   :  { %351 = vmatpush.bf16.msra.mxu3 %v497_v27  ;;  %v510_v42 = vld [vmem:[%s833_s2 + $0x38] sm:$0xf0]  ;;  %v509_v44 = vor.u32 %v561_v40, %v508_v38  ;;  %v560_v47 = vld [vmem:[%s833_s2 + $0x2c] sm:$0xf0]  ;;  %v556_v48 = vld [vmem:[%s833_s2 + $0x14] sm:$0xf] }
   0xc   :  { %546 = vmatmul.msk.bf16.vlgmr.msra.gmra.mxu0 %vm301_vm0, %v38_v25  ;;  %547 = vmatmul.msk.bf16.vlgmr.msra.gmra.mxu1 %vm301_vm0, %v38_v25  ;;  %v513_v46 = vor.u32 %v557_v41, %v510_v42  ;;  %v502_v49 = vld [vmem:[%s833_s2 + $0x30] sm:$0xf0]  ;;  %v501_v51 = vor.u32 %v560_v47, %v500_v45  ;;  %v37_v52 = vld [vmem:[%s836_s5] sm:$0x3]  ;;  %vm467_vm2 = vcmask 1045508   ;;  %vm469_vm3 = vcmask 1043456  }
   0xd   :  { %548 = vmatmul.msk.bf16.vlgmr.msra.gmra.mxu2 %vm301_vm0, %v38_v25  ;;  %376 = vmatpush.bf16.msrb.mxu1 %v537_v39  ;;  %v505_v50 = vor.u32 %v556_v48, %v502_v49  ;;  %v27_v53 = vld [vmem:[%s837_s0] sm:$0xff] }
   0xe   :  { %389 = vmatpush.bf16.msrb.mxu2 %v541_v31  ;;  %549 = vmatmul.msk.bf16.vlgmr.msra.gmra.mxu3 %vm301_vm0, %v38_v25  ;;  %v30_v54 = vld [vmem:[%s838_s1] sm:$0xff]  ;;  %v28_v55 = vunpack.c.l.bf16 %v27_v53  ;;  %v741_v18 = vunpack.c.h.bf16 %v27_v53 }
   0xf   :  { %402 = vmatpush.bf16.msrb.mxu3 %v545_v32  ;;  %363 = vmatpush.bf16.msrb.mxu0 %v533_v43  ;;  %v31_v56 = vunpack.c.l.bf16 %v30_v54  ;;  %v33_v59 = vld [vmem:[%s839_s3] sm:$0xff]  ;;  %v743_v19 = vunpack.c.h.bf16 %v30_v54 }
  0x10   :  { %178 = vperm.xlu1 %573, %v37_v52   ;;  %96 = vperm.xlu0 %572, %v37_v52   ;;  %v62_v57 = vperm.slane %v28_v55, 0  ;;  %v137_v58 = vperm.slane %v28_v55, 1  ;;  %v63_v60 = vperm.slane %v28_v55, 2  ;;  %v138_v61 = vperm.slane %v28_v55, 3 }
  0x11   :  { %377 = vmatpush.bf16.msrb.mxu1 %v505_v50  ;;  %v182_v62 = vperm.slane %v31_v56, 3  ;;  %v102_v63 = vperm.slane %v31_v56, 2  ;;  %v34_v0 = vunpack.c.l.bf16 %v33_v59  ;;  %v181_v4 = vperm.slane %v31_v56, 1 }
  0x12   :  { %390 = vmatpush.bf16.msrb.mxu2 %v509_v44  ;;  %v78_v1 = vperm.slane %v62_v57, 0  ;;  %v153_v2 = vperm.slane %v137_v58, 1  ;;  %v103_v5 = vperm.slane %v31_v56, 4  ;;  %v139_v6 = vperm.slane %v28_v55, 5 }
  0x13   :  { %403 = vmatpush.bf16.msrb.mxu3 %v513_v46  ;;  %364 = vmatpush.bf16.msrb.mxu0 %v501_v51  ;;  %v183_v7 = vperm.slane %v31_v56, 5  ;;  %v79_v8 = vperm.slane %v63_v60, 0  ;;  %v154_v9 = vperm.slane %v138_v61, 1  ;;  %v198_v10 = vperm.slane %v182_v62, 1 }
  0x14   :  { %v101_v11 = vperm.slane %v31_v56, 0  ;;  %v118_v12 = vperm.slane %v102_v63, 0  ;;  %v413_v13 = vperm.slane %v34_v0, 4  ;;  %v65_v14 = vperm.slane %v28_v55, 6 }
  0x15   :  { %v104_v15 = vperm.slane %v31_v56, 6  ;;  %v140_v16 = vperm.slane %v28_v55, 7  ;;  %v184_v17 = vperm.slane %v31_v56, 7  ;;  %v197_v21 = vperm.slane %v181_v4, 1 }
  0x16   :  { %v411_v23 = vperm.slane %v34_v0, 0  ;;  %v412_v24 = vperm.slane %v34_v0, 2  ;;  %v119_v26 = vperm.slane %v103_v5, 0  ;;  %v155_v27 = vperm.slane %v139_v6, 1 }
  0x17   :  { %v199_v28 = vperm.slane %v183_v7, 1  ;;  %v414_v29 = vperm.slane %v34_v0, 6  ;;  %v117_v30 = vperm.slane %v101_v11, 0  ;;  %v429_v31 = vperm.slane %v413_v13, 0 }
  0x18   :  { %574 = vset.pattern.permute.xlu0 %v575_v3  ;;  %v64_v3 = vperm.slane %v28_v55, 4  ;;  %v81_v32 = vperm.slane %v65_v14, 0  ;;  %v120_v33 = vperm.slane %v104_v15, 0  ;;  %v156_v34 = vperm.slane %v140_v16, 1 }
  0x19   :  { %v200_v35 = vperm.slane %v184_v17, 1  ;;  %v66_v36 = vperm.slane %v741_v18, 0  ;;  %v105_v37 = vperm.slane %v743_v19, 0  ;;  %v427_v40 = vperm.slane %v411_v23, 0 }
  0x1a   :  { %v80_v22 = vperm.slane %v64_v3, 0  ;;  %v428_v41 = vperm.slane %v412_v24, 0  ;;  %v430_v42 = vperm.slane %v414_v29, 0  ;;  %v753_v43 = vunpack.c.h.bf16 %v33_v59 }
  0x1b   :  { %v141_v44 = vperm.slane %v741_v18, 1  ;;  %v185_v45 = vperm.slane %v743_v19, 1  ;;  %v67_v48 = vperm.slane %v741_v18, 2  ;;  %v106_v49 = vperm.slane %v743_v19, 2 }
  0x1c   :  { %550 = vmatmul.msk.bf16.vlgmr.msrb.gmra.mxu0 %vm301_vm0, %v38_v25  ;;  %551 = vmatmul.msk.bf16.vlgmr.msrb.gmra.mxu1 %vm301_vm0, %v38_v25  ;;  %v762_v51 = vperm.slane %v66_v36, 0  ;;  %v764_v52 = vperm.slane %v105_v37, 0  ;;  %v142_v53 = vperm.slane %v741_v18, 3  ;;  %v107_v29 = vperm.slane %v743_v19, 4 }
  0x1d   :  { %552 = vmatmul.msk.bf16.vlgmr.msrb.gmra.mxu2 %vm301_vm0, %v38_v25  ;;  %v782_v7 = vperm.slane %v141_v44, 1  ;;  %v83_v17 = vperm.slane %v67_v48, 0 }
  0x1e   :  { %553 = vmatmul.msk.bf16.vlgmr.msrb.gmra.mxu3 %vm301_vm0, %v38_v25  ;;  %v123_v48 = vperm.slane %v107_v29, 0 }
  0x7a   :  { %v745_v20 = vpop.permute.xlu1 %134  ;;  %v747_v25 = vpop.permute.xlu0 %57 }
  0x7b   :  { %v87_v38 = vmul.f32 %v79_v8, %v747_v25  ;;  %v162_v39 = vmul.f32 %v154_v9, %v745_v20  ;;  %v86_v46 = vmul.f32 %v78_v1, %v747_v25  ;;  %v161_v47 = vmul.f32 %v153_v2, %v745_v20 }
  0x7c   :  { %v163_v50 = vmul.f32 %v155_v27, %v745_v20  ;;  %v88_v56 = vmul.f32 %v80_v22, %v747_v25  ;;  %v89_v57 = vmul.f32 %v81_v32, %v747_v25  ;;  %v164_v58 = vmul.f32 %v156_v34, %v745_v20 }
  0x7d   :  { %v170_v54 = vadd.f32 %v162_v39, %v87_v38  ;;  %v169_v1 = vadd.f32 %v161_v47, %v86_v46  ;;  %v784_v8 = vperm.slane %v185_v45, 1  ;;  %v415_v9 = vperm.slane %v753_v43, 0 }
  0x7e   :  { %v171_v15 = vadd.f32 %v163_v50, %v88_v56  ;;  %v172_v22 = vadd.f32 %v164_v58, %v89_v57  ;;  %v122_v27 = vperm.slane %v106_v49, 0  ;;  %v187_v34 = vperm.slane %v743_v19, 5 }
  0x7f   :  { %v416_v39 = vperm.slane %v753_v43, 2  ;;  %v143_v49 = vperm.slane %v741_v18, 5  ;;  %v69_v50 = vperm.slane %v741_v18, 6  ;;  %v144_v57 = vperm.slane %v741_v18, 7 }
  0x82   :  { %v767_v55 = vpop.permute.xlu1 %178  ;;  %v774_v62 = vpop.permute.xlu0 %96 }
  0x83   :  { %v205_v60 = vmul.f32 %v197_v21, %v767_v55  ;;  %v206_v61 = vmul.f32 %v198_v10, %v767_v55  ;;  %v207_v63 = vmul.f32 %v199_v28, %v767_v55  ;;  %v208_v0 = vmul.f32 %v200_v35, %v767_v55 }
  0x84   :  { %v125_v3 = vmul.f32 %v117_v30, %v774_v62  ;;  %v126_v4 = vmul.f32 %v118_v12, %v774_v62  ;;  %v127_v5 = vmul.f32 %v119_v26, %v774_v62  ;;  %v128_v6 = vmul.f32 %v120_v33, %v774_v62 }
  0x85   :  { %v186_v12 = vperm.slane %v743_v19, 3  ;;  %v158_v28 = vperm.slane %v142_v53, 1  ;;  %v108_v35 = vperm.slane %v743_v19, 6 }
  0x86   :  { %v213_v11 = vadd.f32 %v205_v60, %v125_v3  ;;  %v214_v13 = vadd.f32 %v206_v61, %v126_v4  ;;  %v215_v14 = vadd.f32 %v207_v63, %v127_v5  ;;  %v216_v16 = vadd.f32 %v208_v0, %v128_v6 }
  0x87   :  { %v202_v47 = vperm.slane %v186_v12, 1  ;;  %v124_v56 = vperm.slane %v108_v35, 0  ;;  %v130_v0 = vmul.f32 %v122_v27, %v774_v62  ;;  %v159_v3 = vperm.slane %v143_v49, 1 }
  0x88   :  { %v435_v23 = vmul.f32 %v427_v40, %v213_v11  ;;  %v436_v24 = vmul.f32 %v428_v41, %v214_v13  ;;  %v437_v26 = vmul.f32 %v429_v31, %v215_v14  ;;  %v438_v32 = vmul.f32 %v430_v42, %v216_v16 }
  0x89   :  { %v314_v59 = vpop.f32.mrf.mxu0  ;;  %v327_v2 = vpop.f32.mrf.mxu1  ;;  %v68_v40 = vperm.slane %v741_v18, 4  ;;  %v188_v31 = vperm.slane %v743_v19, 7  ;;  %v166_v19 = vmul.f32 %v158_v28, %v745_v20  ;;  %v417_v4 = vperm.slane %v753_v43, 4 }
  0x8a   :  { %v328_v10 = vadd.f32 %v327_v2, %v170_v54  ;;  %v315_v21 = vadd.f32 %v314_v59, %v169_v1  ;;  %v203_v54 = vperm.slane %v187_v34, 1  ;;  %v91_v59 = vmul.f32 %v83_v17, %v747_v25 }
  0x8b   :  { %v204_v60 = vperm.slane %v188_v31, 1  ;;  %v210_v1 = vmul.f32 %v202_v47, %v767_v55  ;;  %v84_v2 = vperm.slane %v68_v40, 0  ;;  %v85_v5 = vperm.slane %v69_v50, 0 }
  0x8c   :  { %v444_v33 = vadd.f32 %v436_v24, %v328_v10  ;;  %v443_v44 = vadd.f32 %v435_v23, %v315_v21  ;;  %v432_v10 = vperm.slane %v416_v39, 0  ;;  %v160_v11 = vperm.slane %v144_v57, 1 }
  0x8d   :  { %v418_v13 = vperm.slane %v753_v43, 6  ;;  %v90_v16 = vmul.f32 %v762_v51, %v747_v25  ;;  %v131_v12 = vmul.f32 %v123_v48, %v774_v62  ;;  %v211_v21 = vmul.f32 %v203_v54, %v767_v55 }
  0x8e   :  { %v459_v45 = vrot.slane %v444_v33, 6  ;;  %v218_v23 = vadd.f32 %v210_v1, %v130_v0  ;;  %v212_v27 = vmul.f32 %v204_v60, %v767_v55  ;;  %v165_v28 = vmul.f32 %v782_v7, %v745_v20 }
  0x8f   :  { %v92_v51 = vmul.f32 %v84_v2, %v747_v25  ;;  %v167_v29 = vmul.f32 %v159_v3, %v745_v20  ;;  %v209_v33 = vmul.f32 %v784_v8, %v767_v55  ;;  %v168_v35 = vmul.f32 %v160_v11, %v745_v20 }
  0x90   :  { %v340_v30 = vpop.f32.mrf.mxu2  ;;  %v466_v63 = vsel %vm465_vm1, %v443_v44, %v459_v45  ;;  %v434_v7 = vperm.slane %v418_v13, 0  ;;  %v431_v40 = vperm.slane %v415_v9, 0 }
  0x91   :  { %v341_v36 = vadd.f32 %v340_v30, %v171_v15  ;;  %v353_v37 = vpop.f32.mrf.mxu3  ;;  %v316_v38 = vpop.f32.mrf.mxu0  ;;  %v93_v30 = vmul.f32 %v85_v5, %v747_v25  ;;  %v175_v31 = vadd.f32 %v167_v29, %v92_v51 }
  0x92   :  { %v354_v41 = vadd.f32 %v353_v37, %v172_v22  ;;  %v329_v46 = vpop.f32.mrf.mxu1  ;;  %v174_v22 = vadd.f32 %v166_v19, %v91_v59  ;;  %v433_v37 = vperm.slane %v417_v4, 0  ;;  %v440_v38 = vmul.f32 %v432_v10, %v218_v23 }
  0x93   :  { %v445_v42 = vadd.f32 %v437_v26, %v341_v36  ;;  %v132_v26 = vmul.f32 %v124_v56, %v774_v62  ;;  %v219_v36 = vadd.f32 %v211_v21, %v131_v12 }
  0x94   :  { %v446_v53 = vadd.f32 %v438_v32, %v354_v41  ;;  %v129_v32 = vmul.f32 %v764_v52, %v774_v62  ;;  %v173_v41 = vadd.f32 %v165_v28, %v90_v16  ;;  %v176_v52 = vadd.f32 %v168_v35, %v93_v30 }
  0x95   :  { %v460_v58 = vrot.slane %v445_v42, 4  ;;  %v220_v39 = vadd.f32 %v212_v27, %v132_v26  ;;  %v441_v46 = vmul.f32 %v433_v37, %v219_v36 }
  0x96   :  { %v461_v61 = vrot.slane %v446_v53, 2  ;;  %v217_v25 = vadd.f32 %v209_v33, %v129_v32 }
  0x97   :  { %v442_v42 = vmul.f32 %v434_v7, %v220_v39 }
  0x98   :  { %v468_v18 = vsel %vm467_vm2, %v460_v58, %v461_v61  ;;  %v342_v6 = vpop.f32.mrf.mxu2  ;;  %v439_v50 = vmul.f32 %v431_v40, %v217_v25 }
  0x99   :  { %v470_v14 = vsel %vm469_vm3, %v466_v63, %v468_v18  ;;  %v355_v15 = vpop.f32.mrf.mxu3  ;;  %v366_v17 = vpop.f32.mrf.mxu0 }
  0x9a   :  { %476 = vst [vmem:[%s840_s7] sm:$0xff] %v470_v14  ;;  %v379_v24 = vpop.f32.mrf.mxu1  ;;  %v367_v47 = vadd.f32 %v366_v17, %v173_v41 }
  0x9b   :  { %v380_v34 = vadd.f32 %v379_v24, %v174_v22 }
  0x9c   :  { %v447_v9 = vadd.f32 %v439_v50, %v367_v47 }
  0x9d   :  { %v448_v44 = vadd.f32 %v440_v38, %v380_v34 }
  0x9f   :  { %v462_v53 = vrot.slane %v448_v44, 6 }
  0xa0   :  { %v392_v45 = vpop.f32.mrf.mxu2 }
  0xa1   :  { %v393_v62 = vadd.f32 %v392_v45, %v175_v31  ;;  %v405_v55 = vpop.f32.mrf.mxu3  ;;  %v368_v8 = vpop.f32.mrf.mxu0  ;;  %v471_v57 = vsel %vm465_vm1, %v447_v9, %v462_v53 }
  0xa2   :  { %v406_v20 = vadd.f32 %v405_v55, %v176_v52  ;;  %v381_v48 = vpop.f32.mrf.mxu1 }
  0xa3   :  { %v449_v49 = vadd.f32 %v441_v46, %v393_v62 }
  0xa4   :  { %v450_v54 = vadd.f32 %v442_v42, %v406_v20 }
  0xa5   :  { %v463_v43 = vrot.slane %v449_v49, 4 }
  0xa6   :  { %v464_v56 = vrot.slane %v450_v54, 2 }
  0xa8   :  { %v472_v58 = vsel %vm467_vm2, %v463_v43, %v464_v56  ;;  %v394_v59 = vpop.f32.mrf.mxu2 }
  0xa9   :  { %v473_v19 = vsel %vm469_vm3, %v471_v57, %v472_v58  ;;  %v407_v60 = vpop.f32.mrf.mxu3 }
  0xaa   :  { %477 = vst [vmem:[%s840_s7 + $0x8] sm:$0xff] %v473_v19 }

</bundles_post_ra>
